<compile_context>
chip_gen: v7x
topology: tpu7x:2x2x1
jax: 0.10.0
libtpu: 0.0.40
codegen_flags: <defaults>
</compile_context>

<pallas_src>
import jax
import jax.numpy as jnp
from jax.experimental import pallas as pl
from jax.experimental.pallas import tpu as pltpu


def _focus_conv_kernel(x_ref, w_ref, b_ref, o_ref):
    """One (batch, pixel-tile) grid step.

    x_ref: (1, 4C, TILE_P) bf16  space-to-depth input slab (channel-major)
    w_ref: (c2, 4C)        bf16  1x1-conv weight with BN scale folded in
    b_ref: (c2, 1)         f32   folded BN bias
    o_ref: (1, c2, TILE_P) bf16  output slab
    """
    x = x_ref[0]                                                      # (4C, TILE_P)
    y = jnp.dot(w_ref[...], x, preferred_element_type=jnp.float32)    # (c2, TILE_P) f32
    y = y + b_ref[...]                                                # per-channel bias
    sig = pl.reciprocal(1.0 + jnp.exp(-y), approx=True)               # EUP exp + EUP rcp
    o_ref[0] = (y * sig).astype(o_ref.dtype)                          # SiLU, narrow on store


def _choose_tile(P, max_tile):
    """Pick a lane tile. Prefer tile_p == P, else a 128-multiple divisor of P
    (no padding), else fall back to padding."""
    if P <= max_tile:
        return P, P
    t = (max_tile // 128) * 128
    while t >= 128:
        if P % t == 0:
            return t, P
        t -= 128
    t = (max_tile // 128) * 128
    return t, pl.cdiv(P, t) * t


def focus_forward(x, conv_w, bn_gamma, bn_beta, bn_mean, bn_var, *,
                  eps=1e-5, max_tile_p=8192, out_dtype=jnp.bfloat16):
    """x: (B, C, H, W) float32; conv_w: (c2, 4C) 1x1-conv weight (no bias)."""
    B, C, H, W = x.shape
    c2, c4 = conv_w.shape
    assert c4 == 4 * C and H % 2 == 0 and W % 2 == 0
    Hh, Wh = H // 2, W // 2
    P = Hh * Wh

    # --- Focus space-to-depth (torch.cat order) -- one bf16 XLA fusion pass ------
    x_cat = jnp.concatenate(
        [x[:, :, ::2, ::2], x[:, :, 1::2, ::2],
         x[:, :, ::2, 1::2], x[:, :, 1::2, 1::2]], axis=1)             # (B, 4C, Hh, Wh)
    x_flat = x_cat.reshape(B, c4, P).astype(jnp.bfloat16)              # lanes = pixels

    # --- fold BatchNorm (eval) into the conv: y = (scale*W) @ x + shift ----------
    scale = bn_gamma / jnp.sqrt(bn_var + eps)                          # (c2,)
    w_folded = (conv_w * scale[:, None]).astype(jnp.bfloat16)          # (c2, 4C) bf16
    shift = (bn_beta - bn_mean * scale)[:, None].astype(jnp.float32)   # (c2, 1)  f32

    # --- tile over the pixel (lane) axis; avoid pad/slice round trips ------------
    tile_p, P_pad = _choose_tile(P, max_tile_p)
    if P_pad != P:   # fallback only; divisor search normally avoids this
        x_flat = jnp.pad(x_flat, ((0, 0), (0, 0), (0, P_pad - P)))

    grid = (B, P_pad // tile_p)
    out = pl.pallas_call(
        _focus_conv_kernel,
        out_shape=jax.ShapeDtypeStruct((B, c2, P_pad), out_dtype),
        grid=grid,
        in_specs=[
            pl.BlockSpec((1, c4, tile_p), lambda b, i: (b, 0, i)),
            pl.BlockSpec((c2, c4), lambda b, i: (0, 0)),     # resident weight
            pl.BlockSpec((c2, 1), lambda b, i: (0, 0)),      # resident bias
        ],
        out_specs=pl.BlockSpec((1, c2, tile_p), lambda b, i: (b, 0, i)),
        compiler_params=pltpu.CompilerParams(
            dimension_semantics=("parallel", "parallel"),
            vmem_limit_bytes=48 * 1024 * 1024),
    )(x_flat, w_folded, shift)

    if P_pad != P:
        out = out[:, :, :P]
    return out.reshape(B, c2, Hh, Wh)


if __name__ == "__main__":
    B, C, H, W = 2, 4, 16, 16
    c2 = 32
    eps = 1e-5

    key = jax.random.PRNGKey(0)
    kx, kw, kg, kb, km, kv = jax.random.split(key, 6)
    x = jax.random.normal(kx, (B, C, H, W), jnp.float32)
    conv_w = jax.random.normal(kw, (c2, 4 * C), jnp.float32) * 0.1
    bn_gamma = 1.0 + 0.1 * jax.random.normal(kg, (c2,), jnp.float32)
    bn_beta = 0.1 * jax.random.normal(kb, (c2,), jnp.float32)
    bn_mean = 0.1 * jax.random.normal(km, (c2,), jnp.float32)
    bn_var = 0.5 + jax.nn.softplus(jax.random.normal(kv, (c2,), jnp.float32))

    out = focus_forward(x, conv_w, bn_gamma, bn_beta, bn_mean, bn_var, eps=eps)
    out = jax.block_until_ready(out)

    # --- plain-JAX f32 reference: space-to-depth -> 1x1 conv -> BN(eval) -> SiLU -
    x_cat = jnp.concatenate(
        [x[:, :, ::2, ::2], x[:, :, 1::2, ::2],
         x[:, :, ::2, 1::2], x[:, :, 1::2, 1::2]], axis=1)
    y = jnp.einsum('oc,bchw->bohw', conv_w, x_cat)
    y = (y - bn_mean[None, :, None, None]) / jnp.sqrt(bn_var + eps)[None, :, None, None]
    y = y * bn_gamma[None, :, None, None] + bn_beta[None, :, None, None]
    ref = y * jax.nn.sigmoid(y)

    assert out.shape == (B, c2, H // 2, W // 2)
    err = float(jnp.max(jnp.abs(out.astype(jnp.float32) - ref)))
    # bf16 streaming I/O + approx reciprocal -> compare against the f32 reference
    # with a bf16-appropriate tolerance.
    assert err < 5e-2, err
    print("KERNEL_OK")
</pallas_src>

<mosaic_0001>
module attributes {stable_mosaic.version = 11 : i64} {
  func.func @_focus_conv_kernel(%arg0: i32, %arg1: i32, %arg2: memref<1x16x64xbf16, #tpu.memory_space<vmem>>, %arg3: memref<32x16xbf16, #tpu.memory_space<vmem>>, %arg4: memref<32x1xf32, #tpu.memory_space<vmem>>, %arg5: memref<1x32x64xbf16, #tpu.memory_space<vmem>>) attributes {dimension_semantics = [#tpu.dimension_semantics<parallel>, #tpu.dimension_semantics<parallel>], iteration_bounds = array<i64: 2, 1>, scalar_prefetch = 0 : i64, scratch_operands = 0 : i64, tpu.core_type = #tpu.core_type<tc>, window_params = [{transform_indices = @transform_0, window_bounds = array<i64: 1, 16, 64>}, {pipeline_mode = #tpu.pipeline_mode<synchronous>, transform_indices = @transform_1, window_bounds = array<i64: 32, 16>}, {pipeline_mode = #tpu.pipeline_mode<synchronous>, transform_indices = @transform_2, window_bounds = array<i64: 32, 1>}, {transform_indices = @transform_3, window_bounds = array<i64: 1, 32, 64>}]} {
    %c0 = arith.constant 0 : index
    %c0_0 = arith.constant 0 : index
    %c0_1 = arith.constant 0 : index
    %0 = vector.load %arg2[%c0, %c0_0, %c0_1] : memref<1x16x64xbf16, #tpu.memory_space<vmem>>, vector<1x16x64xbf16>
    %1 = vector.shape_cast %0 : vector<1x16x64xbf16> to vector<16x64xbf16>
    %c0_2 = arith.constant 0 : index
    %c0_3 = arith.constant 0 : index
    %2 = vector.load %arg3[%c0_2, %c0_3] : memref<32x16xbf16, #tpu.memory_space<vmem>>, vector<32x16xbf16>
    %cst = arith.constant dense<0.000000e+00> : vector<32x64xf32>
    %3 = tpu.matmul %2, %1, %cst {dimension_numbers = #tpu.dot_dimension_numbers<[1], [0], [0], [1], [0, 0, 1, 1], [], []>} : vector<32x16xbf16>, vector<16x64xbf16>, vector<32x64xf32> -> vector<32x64xf32>
    %c0_4 = arith.constant 0 : index
    %c0_5 = arith.constant 0 : index
    %4 = vector.load %arg4[%c0_4, %c0_5] : memref<32x1xf32, #tpu.memory_space<vmem>>, vector<32x1xf32>
    %5 = vector.broadcast %4 : vector<32x1xf32> to vector<32x64xf32>
    %6 = arith.addf %3, %5 : vector<32x64xf32>
    %cst_6 = arith.constant 0.000000e+00 : f32
    %7 = vector.broadcast %cst_6 : f32 to vector<32x64xf32>
    %8 = arith.subf %7, %6 : vector<32x64xf32>
    %9 = math.exp %8 : vector<32x64xf32>
    %cst_7 = arith.constant 1.000000e+00 : f32
    %10 = vector.broadcast %cst_7 : f32 to vector<32x64xf32>
    %11 = arith.addf %10, %9 : vector<32x64xf32>
    %12 = tpu.reciprocal %11 {approx = true} : vector<32x64xf32> -> vector<32x64xf32>
    %13 = arith.mulf %6, %12 : vector<32x64xf32>
    %14 = arith.truncf %13 : vector<32x64xf32> to vector<32x64xbf16>
    %c0_8 = arith.constant 0 : index
    %c0_9 = arith.constant 0 : index
    %c0_10 = arith.constant 0 : index
    %15 = vector.load %arg5[%c0_8, %c0_9, %c0_10] : memref<1x32x64xbf16, #tpu.memory_space<vmem>>, vector<1x32x64xbf16>
    %16 = vector.shape_cast %15 : vector<1x32x64xbf16> to vector<32x64xbf16>
    %17 = vector.shape_cast %14 : vector<32x64xbf16> to vector<1x32x64xbf16>
    tpu.vector_store %arg5[%c0_8, %c0_9, %c0_10], %17 {strides = array<i32>} : memref<1x32x64xbf16, #tpu.memory_space<vmem>>, vector<1x32x64xbf16>,
    return
  }
  func.func @transform_0(%arg0: i32, %arg1: i32) -> (i32, i32, i32) {
    %c0_i32 = arith.constant 0 : i32
    %c0_i32_0 = arith.constant 0 : i32
    return %arg0, %c0_i32, %arg1 : i32, i32, i32
  }
  func.func @transform_1(%arg0: i32, %arg1: i32) -> (i32, i32) {
    %c0_i32 = arith.constant 0 : i32
    %c0_i32_0 = arith.constant 0 : i32
    %c0_i32_1 = arith.constant 0 : i32
    return %c0_i32, %c0_i32_0 : i32, i32
  }
  func.func @transform_2(%arg0: i32, %arg1: i32) -> (i32, i32) {
    %c0_i32 = arith.constant 0 : i32
    %c0_i32_0 = arith.constant 0 : i32
    %c0_i32_1 = arith.constant 0 : i32
    return %c0_i32, %c0_i32_0 : i32, i32
  }
  func.func @transform_3(%arg0: i32, %arg1: i32) -> (i32, i32, i32) {
    %c0_i32 = arith.constant 0 : i32
    %c0_i32_0 = arith.constant 0 : i32
    return %arg0, %c0_i32, %arg1 : i32, i32, i32
  }
}

</mosaic_0001>

<bundles_post_ra>
// kernel: tpu_custom_call.1
= control target key start
LH: loop header
LB: loop body
LE: loop exit
PB: predicated region body
PF: predicated region fallthrough
CT: control target
= control target key end

     0   :  { %8 = vsyncpa [#allocation3], 0  ;;  %s794_s0 = inlined_call_operand.vmem [shape: bf16[2,16,64], index: 0, kind: input, shape index: {}]   ;;  %s795_s1 = inlined_call_operand.vmem [shape: bf16[32,16], index: 1, kind: input, shape index: {}]   ;;  %s796_s2 = inlined_call_operand.vmem [shape: f32[32,1], index: 2, kind: input, shape index: {}]   ;;  %s797_s3 = inlined_call_operand.hbm [shape: bf16[2,32,64], index: 3, kind: output, shape index: {}]  }
   0x1   :  { %10 = vsyncpa [#allocation3 + $0x1], 0  ;;  %s655_s12 = smov 0   ;;  %s657_s13 = smov 0  }
   0x2   :  { %s659_s14 = smov 0   ;;  %s661_s15 = smov 0  }
   0x3   :  { %s663_s16 = smov 0   ;;  %s665_s17 = smov 0  }
   0x4 LB: > { %s435_s18 = sadd.s32 4294967295, %s629_s17   ;;  %s436_s19 = sadd.s32 4294967294, %s629_s17   ;;  %s629_s17 = sphi %s665_s17, %s16_s17   ;;  %s625_s16 = sphi %s663_s16, %s804_s16   ;;  %s621_s15 = sphi %s661_s15, %s803_s15   ;;  %s617_s14 = sphi %s659_s14, %s802_s14   ;;  %s613_s13 = sphi %s657_s13, %s801_s13   ;;  %s609_s12 = sphi %s655_s12, %s800_s12  }
   0x5   : > { %s28_s20 = sadd.s32 1, %s625_s16  ;;  %s107_s21 = sadd.s32 1, %s617_s14 }
   0x6   : > { %p30_p0 = scmp.ge.s32.totalorder %s28_s20, 2  ;;  %p117_p1 = scmp.ne.s32.totalorder %s617_s14, %s613_s13 }
   0x7   : > { %p118_p2 = scmp.eq.s32.totalorder %s435_s18, 1  ;;  %p123_p3 = scmp.ne.s32.totalorder %s613_s13, %s609_s12 }
   0x8   : > { %s806_s20 = smov (%p30_p0, %s28_s20), 0  ;;  %p124_p5 = scmp.eq.s32.totalorder %s436_s19, 1 }
   0x9   : > { %p695_p4 = por %p118_p2, %p117_p1  ;;  %s102_s23 = ssub.s32 %s625_s16, %s806_s20 }
   0xa   : > { %p439_p6 = scmp.ge.s32.totalorder %s629_s17, 1  ;;  %p105_p7 = scmp.eq.s32.totalorder %s102_s23, 0 }
   0xb   : > { %p702_p8 = por %p124_p5, %p123_p3  ;;  %p159_p9 = scmp.lt.s32.totalorder %s629_s17, 3 }
   0xc   : > { %s708_s25 = scalar_select %p105_p7, %s617_s14, %s107_s21  }
   0xd   : > { %p160_p10 = pnand %p439_p6, %p159_p9 }
   0xe   : > { %p186_p11 = scmp.lt.s32.totalorder (!%p160_p10), %s621_s15, 1  ;;  %v533_v0 = vld [vmem:[%s795_s1] sm:$0xff] (!%p160_p10)   ;;  %vm241_vm0 = vcmask (!%p160_p10), 130048   ;;  %v203_v1 = vld [vmem:[%s796_s2 + $0x10] sm:$0xff] (!%p160_p10)  ;;  %v631_v3 = vmov (!%p160_p10), 0   ;;  %v204_v4 = vld [vmem:[%s796_s2 + $0x18] sm:$0xff] (!%p160_p10) }
   0xf   : > { %163 = sbr.rel (%p160_p10) target bundleno = 295 (0x127), region = 32  ;;  %468 = vmatprep.mubr.msk.bf16.mxu0 (!%p160_p10), %vm241_vm0, %v533_v0  ;;  %v201_v2 = vld [vmem:[%s796_s2] sm:$0xff] (!%p160_p10)  ;;  %531 = vset.pattern.permute.xlu1 (!%p160_p10), %v631_v3  ;;  %v202_v5 = vld [vmem:[%s796_s2 + $0x8] sm:$0xff] (!%p160_p10)  ;;  %s183_s26 = sand.u32 (!%p160_p10), 1, %s613_s13   ;;  %vm337_vm1 = vcmask (!%p160_p10), 519168  }
  0x10   : > { %530 = vset.pattern.permute.xlu0 (!%p160_p10), %v631_v3  ;;  %217 = vperm.xlu1 (!%p160_p10), %531, %v203_v1   ;;  %v534_v7 = vld [vmem:[%s795_s1 + $0x8] sm:$0xff] (!%p160_p10)   ;;  %s440_s27 = sshll.u32 (!%p160_p10), %s183_s26, 4  ;;  %s632_s8 = smov (!%p160_p10), [#allocation2]  }
  0x11   : > { %207 = vperm.xlu0 (!%p160_p10), %530, %v201_v2   ;;  %s185_s29 = scalar_lea.vmem (!%p160_p10), [#allocation2], %s440_s27 }
  0x12   : > { %s357_s30 = sshll.u32 (!%p160_p10), %s185_s29, 4  ;;  %s743_s30 = int_to_ptr.vmem [resolvable:$true] %s357_s30 }
  0x13   : > { %s551_s7 = scalar_lea.vmem (!%p160_p10), %s743_s30, 256 }
  0x14   : > { %222 = vperm.xlu1 (!%p160_p10), %531, %v204_v4   ;;  %p552_p12 = scmp.ne.s32.totalorder (!%p160_p10), %s743_s30, %s551_s7 }
  0x15   : > { %212 = vperm.xlu0 (!%p160_p10), %530, %v202_v5  }
  0x16   : > { %s187_s28 = scalar_select %p186_p11, %s621_s15, 1 }
  0x17   : > { %p553_p13 = pnand %p552_p12, %p695_p4 }
  0x18   : > { %s457_s6 = sshll.u32 %s187_s28, 3  ;;  %s462_s28 = sshll.u32 %s621_s15, 8 }
  0x19   : > { %s193_s9 = scalar_lea.vmem %s794_s0, %s457_s6  ;;  %s741_s6 = scalar_lea.hbm %s797_s3, %s462_s28 }
  0x1a   : > { %v532_v6 = vld [vmem:[%s193_s9] sm:$0xff]   ;;  %s748_s15 = scalar_lea.sflag [#allocation3], %s183_s26  ;;  %p554_p0 = pneg %p553_p13 }
  0x1b   : > { %466 = vmatprep.subr.bf16.mxu0 %v532_v6  ;;  %s555_s9 = sshll.u32 %s632_s8, 4  ;;  %s556_s9 = int_to_ptr.vmem [resolvable:$false] %s555_s9 }
  0x1c   : > { %467 = vmatpush3.bf16.msra.mxu0 %v532_v6  ;;  %s557_s10 = scalar_lea.vmem %s556_s9, 512  ;;  %p558_p1 = scmp.lt.s32.totalorder %s743_s30, %s556_s9 }
  0x1d   : > { %p559_p2 = scmp.lt.s32.totalorder %s557_s10, %s551_s7 }
  0x1f   : > { %469 = vmatmul.mubr.msk.bf16.vlgmr.msra.gmra.mrb[0].mxu0 %vm241_vm0, %v534_v7  ;;  %p560_p3 = por %p559_p2, %p558_p1 }
  0x21   : > { %p561_p5 = pnand %p560_p3, %p554_p0 }
  0x8f   : > { %v218_v8 = vpop.permute.xlu1 %217 }
  0x90   : > { %v208_v9 = vpop.permute.xlu0 %207 }
  0x93   : > { %v223_v13 = vpop.permute.xlu1 %222 }
  0x94   : > { %v213_v16 = vpop.permute.xlu0 %212 }
  0xf2   : > { %v470_v10 = vpop.f32.mrb[0].mxu0 }
  0xf3   : > { %v291_v11 = vadd.f32 %v470_v10, %v218_v8  ;;  %v282_v12 = vpop.f32.mrb[1].mxu0 }
  0xf4   : > { %v283_v14 = vadd.f32 %v282_v12, %v208_v9  ;;  %v471_v15 = vpop.f32.mrb[2].mxu0 }
  0xf5   : > { %v299_v17 = vsub.f32 0.0, %v291_v11  ;;  %v294_v18 = vadd.f32 %v471_v15, %v223_v13  ;;  %v285_v19 = vpop.f32.mrb[3].mxu0 }
  0xf6   : > { %v297_v20 = vsub.f32 0.0, %v283_v14  ;;  %v286_v21 = vadd.f32 %v285_v19, %v213_v16 }
  0xf7   : > { %v305_v22 = vmul.f32 1.442695, %v299_v17  ;;  %v300_v23 = vsub.f32 0.0, %v294_v18 }
  0xf8   : > { %v301_v24 = vmul.f32 1.442695, %v297_v20  ;;  %v298_v25 = vsub.f32 0.0, %v286_v21 }
  0xf9   : > { %535 = vpow2.f32 %v305_v22  ;;  %v307_v26 = vmul.f32 1.442695, %v300_v23 }
  0xfa   : > { %537 = vpow2.f32 %v301_v24  ;;  %v303_v27 = vmul.f32 1.442695, %v298_v25 }
  0xfb   : > { %539 = vpow2.f32 %v307_v26 }
  0xfc   : > { %541 = vpow2.f32 %v303_v27 }
 0x103   : > { %v536_v28 = vpop.eup %535 }
 0x104   : > { %v538_v29 = vpop.eup %537  ;;  %v311_v30 = vadd.f32 1.0, %v536_v28 }
 0x105   : > { %v540_v31 = vpop.eup %539  ;;  %v309_v32 = vadd.f32 1.0, %v538_v29 }
 0x106   : > { %v542_v33 = vpop.eup %541  ;;  %543 = vrcp.f32 %v311_v30  ;;  %v312_v34 = vadd.f32 1.0, %v540_v31 }
 0x107   : > { %545 = vrcp.f32 %v309_v32  ;;  %v310_v35 = vadd.f32 1.0, %v542_v33 }
 0x108   : > { %547 = vrcp.f32 %v312_v34 }
 0x109   : > { %549 = vrcp.f32 %v310_v35 }
 0x110   : > { %v544_v36 = vpop.eup %543 }
 0x111   : > { %v546_v37 = vpop.eup %545  ;;  %v319_v38 = vmul.f32 %v544_v36, %v291_v11 }
 0x112   : > { %v548_v39 = vpop.eup %547  ;;  %v317_v40 = vmul.f32 %v546_v37, %v283_v14 }
 0x113   : > { %v550_v41 = vpop.eup %549  ;;  %v460_v42 = vpack.c.bf16 %v319_v38, %v319_v38  ;;  %v320_v43 = vmul.f32 %v548_v39, %v294_v18 }
 0x114   : > { %v458_v44 = vpack.c.bf16 %v317_v40, %v317_v40  ;;  %v318_v45 = vmul.f32 %v550_v41, %v286_v21 }
 0x115   : > { %340 = vst.msk [vmem:[%s185_s29 + $0x8] sm:$0xf] %vm337_vm1, %v460_v42  ;;  %v461_v46 = vpack.c.bf16 %v320_v43, %v320_v43 }
 0x116   : > { %338 = vst.msk [vmem:[%s185_s29] sm:$0xf] %vm337_vm1, %v458_v44  ;;  %v459_v47 = vpack.c.bf16 %v318_v45, %v318_v45 }
 0x117   : > { %341 = vst.msk [vmem:[%s185_s29 + $0xc] sm:$0xf] %vm337_vm1, %v461_v46 }
 0x118   : > { %339 = vst.msk [vmem:[%s185_s29 + $0x4] sm:$0xf] %vm337_vm1, %v459_v47 }
 0x119   : > { %564 = shalt.err (!%p561_p5)
}
 0x11a   : > { %s565_s11 = scalar_lea.hbm %s741_s6, 256  ;;  %s569_s21 = scalar_lea.hbm %s797_s3, 512 }
 0x11b   : > { %p566_p6 = scmp.ne.s32.totalorder %s741_s6, %s565_s11  ;;  %p570_p10 = scmp.lt.u32.totalorder %s741_s6, %s797_s3 }
 0x11c   : > { %p571_p11 = scmp.lt.u32.totalorder %s569_s21, %s565_s11  ;;  %p573_p13 = scmp.lt.u32.totalorder %s565_s11, %s741_s6 }
 0x11d   : > { %p567_p7 = pnand %p566_p6, %p695_p4 }
 0x11e   : > { %p572_p12 = por %p571_p11, %p570_p10 }
 0x11f   : > { %p568_p9 = pneg %p567_p7 }
 0x120   : > { %p574_p0 = por %p573_p13, %p572_p12 }
 0x122   : > { %p575_p1 = pnand %p574_p0, %p568_p9 }
 0x124   : > { %578 = shalt.err (!%p575_p1)
}
 0x125   : > { %s633_s27 = smov 64   ;;  %s634_s28 = smov 4  }
 0x126   : > { %472 = dma.vmem_to_hbm [thread:$0]  (%p695_p4), %s743_s30, 256, %s741_s6, %s748_s15, %s633_s27, %s633_s27, %s634_s28  }
 0x127 PF: > { %p478_p2 = scmp.ge.s32.totalorder %s629_s17, 2  ;;  %s372_s29 = sand.u32 1, %s609_s12  }
 0x128   : > { %s373_s4 = scalar_lea.sflag [#allocation3], %s372_s29 }
 0x129   : > { %p475_p3 = pnand %p478_p2, %p702_p8 }
 0x12b   : > { %604 = dma.done.wait (!%p475_p3), %s373_s4, 256  }
 0x12c   : > { %606 = vsyncadd (!%p475_p3), %s373_s4, 4294967040  ;;  %s16_s17 = sadd.s32 1, %s629_s17   ;;  %s800_s12 = smov %s613_s13 }
 0x12d   : > { %p13_p5 = scmp.ge.s32.totalorder %s16_s17, 4   ;;  %s801_s13 = smov %s617_s14 }
 0x12e   : > { %s802_s14 = smov %s708_s25  ;;  %s803_s15 = smov %s625_s16 }
 0x12f   : > { %s804_s16 = smov %s806_s20  ;;  %15 = sbr.rel (!%p13_p5) target bundleno = 4 (0x4), region = 67 }
 0x136   :  { %378 = vsyncpa [#allocation3], 1 }
 0x137   :  { %380 = vsyncpa [#allocation3 + $0x1], 1 }

</bundles_post_ra>
